<compile_context>
chip_gen: v7x
topology: tpu7x:2x2x1
jax: 0.10.0
libtpu: 0.0.40
codegen_flags: <defaults>
</compile_context>

<pallas_src>
import functools

import jax
import jax.numpy as jnp
from jax.experimental import pallas as pl
from jax.experimental.pallas import tpu as pltpu

D_IN = 6             # observation features
H1, H2 = 100, 250    # logical (PyTorch) hidden sizes
H1P, H2P = 128, 256  # lane-padded hidden sizes


def actor_net_kernel(x_ref,
                     w_fc_ref, b_fc_ref,
                     w_a_ref, b_a_ref,
                     w_b_ref, b_b_ref,
                     w_head_ref, b_head_ref,
                     out_ref):
    dt = w_fc_ref.dtype          # bf16 (fast path) or f32 (parity path)
    x = x_ref[...]               # (TB, 6) f32

    # fc: 6 -> 128 (zero-padded 100), relu
    h = jnp.dot(x.astype(dt), w_fc_ref[...], preferred_element_type=jnp.float32)
    h = jnp.maximum(h + b_fc_ref[...], 0.0)                      # (TB, 128)

    # a: 128 -> 256 (zero-padded 100 -> 250), relu
    h = jnp.dot(h.astype(dt), w_a_ref[...], preferred_element_type=jnp.float32)
    h = jnp.maximum(h + b_a_ref[...], 0.0)                       # (TB, 256)

    # b: 256 -> 128 (zero-padded 250 -> 100), relu
    h = jnp.dot(h.astype(dt), w_b_ref[...], preferred_element_type=jnp.float32)
    h = jnp.maximum(h + b_b_ref[...], 0.0)                       # (TB, 128)

    # fused heads, computed transposed so the output is lane-dense:
    # (128, 2) contracted (dim 0) with (TB, 128) (dim 1) -> (2, TB)
    head_t = jax.lax.dot_general(
        w_head_ref[...], h.astype(dt),
        dimension_numbers=(((0,), (1,)), ((), ())),
        preferred_element_type=jnp.float32)
    head_t = head_t + b_head_ref[...]                            # (2,1) bcast

    # row 0 = mu = tanh, row 1 = sigma = softplus (single stable path)
    out_ref[0:1, :] = jnp.tanh(head_t[0:1, :])
    z = head_t[1:2, :]
    out_ref[1:2, :] = jnp.maximum(z, 0.0) + jnp.log1p(jnp.exp(-jnp.abs(z)))


def init_params(key):
    """PyTorch-Linear-style init: U(-1/sqrt(fan_in), 1/sqrt(fan_in)).
    Weights stored as (in, out); biases as (1, out)."""
    dims = [
        ("fc", D_IN, H1),
        ("a", H1, H2),
        ("b", H2, H1),
        ("mu", H1, 1),
        ("sig", H1, 1),
    ]
    params = {}
    for name, fan_in, fan_out in dims:
        key, kw, kb = jax.random.split(key, 3)
        bound = 1.0 / jnp.sqrt(jnp.float32(fan_in))
        params[f"w_{name}"] = jax.random.uniform(
            kw, (fan_in, fan_out), jnp.float32, -bound, bound)
        params[f"b_{name}"] = jax.random.uniform(
            kb, (1, fan_out), jnp.float32, -bound, bound)
    return params


def pack_params(params, *, dtype=jnp.bfloat16):
    """Fuse the two heads, zero-pad hidden dims to lane multiples, transpose
    the head bias, and cast weights to the MXU dtype (biases stay f32)."""
    def pad(a, shape):
        return jnp.pad(a, [(0, t - s) for s, t in zip(a.shape, shape)])

    w_head = jnp.concatenate([params["w_mu"], params["w_sig"]], axis=1)      # (100, 2)
    b_head_t = jnp.concatenate([params["b_mu"], params["b_sig"]], axis=1).T  # (2, 1)
    return dict(
        w_fc=pad(params["w_fc"], (D_IN, H1P)).astype(dtype),
        b_fc=pad(params["b_fc"], (1, H1P)),
        w_a=pad(params["w_a"], (H1P, H2P)).astype(dtype),
        b_a=pad(params["b_a"], (1, H2P)),
        w_b=pad(params["w_b"], (H2P, H1P)).astype(dtype),
        b_b=pad(params["b_b"], (1, H1P)),
        w_head=pad(w_head, (H1P, 2)).astype(dtype),
        b_head=b_head_t,
    )


def _round_up(n, m):
    return ((n + m - 1) // m) * m


@functools.partial(jax.jit, static_argnames=("block_b",))
def actor_net_forward(x, packed, *, block_b=2048):
    """x: (B, 6) float32; packed: output of pack_params. Returns (mu, sigma)."""
    B = x.shape[0]
    if B <= 256:
        TB = B                                   # single tile == full array
    else:
        # Keep the grid >= 2 steps so v7x's two TensorCores both get work;
        # TB a multiple of 256, capped at block_b (fits VMEM on all gens).
        TB = min(block_b, _round_up(pl.cdiv(B, 2), 256))
    Bp = _round_up(B, TB)
    if Bp != B:
        x = jnp.pad(x, ((0, Bp - B), (0, 0)))
    grid = (Bp // TB,)

    def full_spec(a):
        # Weights/biases: full block, constant index -> VMEM-resident.
        # TODO(synk): pipeline_mode=pl.Buffered(1) to single-buffer these
        # constant-index operands once verified on all target generations.
        return pl.BlockSpec(a.shape, lambda i: (0, 0))

    out = pl.pallas_call(
        actor_net_kernel,
        out_shape=jax.ShapeDtypeStruct((2, Bp), jnp.float32),
        grid=grid,
        in_specs=[
            pl.BlockSpec((TB, D_IN), lambda i: (i, 0)),
            full_spec(packed["w_fc"]), full_spec(packed["b_fc"]),
            full_spec(packed["w_a"]), full_spec(packed["b_a"]),
            full_spec(packed["w_b"]), full_spec(packed["b_b"]),
            full_spec(packed["w_head"]), full_spec(packed["b_head"]),
        ],
        out_specs=pl.BlockSpec((2, TB), lambda i: (0, i)),   # lane-dense output
        compiler_params=pltpu.CompilerParams(
            dimension_semantics=("parallel",)),
    )(
        x,
        packed["w_fc"], packed["b_fc"],
        packed["w_a"], packed["b_a"],
        packed["w_b"], packed["b_b"],
        packed["w_head"], packed["b_head"],
    )

    mu = out[0, :B].reshape(B, 1)
    sigma = out[1, :B].reshape(B, 1)
    return mu, sigma


def actor_net_reference(x, params):
    """Pure-JAX reference (unpadded, unfused, f32) for correctness check."""
    h = jax.nn.relu(x @ params["w_fc"] + params["b_fc"])
    h = jax.nn.relu(h @ params["w_a"] + params["b_a"])
    h = jax.nn.relu(h @ params["w_b"] + params["b_b"])
    mu = 1.0 * jnp.tanh(h @ params["w_mu"] + params["b_mu"])
    sigma = jax.nn.softplus(h @ params["w_sig"] + params["b_sig"])
    return mu, sigma


if __name__ == "__main__":
    key = jax.random.PRNGKey(0)
    key, kx = jax.random.split(key)

    B = 8                                   # small batch (matches PPO usage)
    x = jax.random.normal(kx, (B, D_IN), jnp.float32)
    params = init_params(key)
    mu_ref, sigma_ref = actor_net_reference(x, params)

    # 1) Exact-parity path: f32-packed weights.
    packed_f32 = pack_params(params, dtype=jnp.float32)
    mu, sigma = actor_net_forward(x, packed_f32)
    jax.block_until_ready((mu, sigma))
    assert mu.shape == (B, 1) and sigma.shape == (B, 1)
    assert jnp.allclose(mu, mu_ref, atol=1e-5, rtol=1e-5)
    assert jnp.allclose(sigma, sigma_ref, atol=1e-5, rtol=1e-5)

    # 2) Fast path: bf16 weights on the MXU (looser tolerance vs f32 ref).
    packed_bf16 = pack_params(params, dtype=jnp.bfloat16)
    mu_b, sigma_b = actor_net_forward(x, packed_bf16)
    jax.block_until_ready((mu_b, sigma_b))
    assert jnp.allclose(mu_b, mu_ref, atol=5e-2, rtol=5e-2)
    assert jnp.allclose(sigma_b, sigma_ref, atol=5e-2, rtol=5e-2)

    # 3) Multi-tile batch path (grid >= 2, padded batch, lane-dense output).
    xb = jax.random.normal(jax.random.PRNGKey(1), (1000, D_IN), jnp.float32)
    mu2, sigma2 = actor_net_forward(xb, packed_f32)
    jax.block_until_ready((mu2, sigma2))
    mu2_ref, sigma2_ref = actor_net_reference(xb, params)
    assert mu2.shape == (1000, 1) and sigma2.shape == (1000, 1)
    assert jnp.allclose(mu2, mu2_ref, atol=1e-5, rtol=1e-5)
    assert jnp.allclose(sigma2, sigma2_ref, atol=1e-5, rtol=1e-5)

    print("KERNEL_OK")
</pallas_src>

<mosaic_0001>
module attributes {stable_mosaic.version = 11 : i64} {
  func.func @actor_net_kernel(%arg0: i32, %arg1: memref<8x6xf32, #tpu.memory_space<vmem>>, %arg2: memref<6x128xf32, #tpu.memory_space<vmem>>, %arg3: memref<1x128xf32, #tpu.memory_space<vmem>>, %arg4: memref<128x256xf32, #tpu.memory_space<vmem>>, %arg5: memref<1x256xf32, #tpu.memory_space<vmem>>, %arg6: memref<256x128xf32, #tpu.memory_space<vmem>>, %arg7: memref<1x128xf32, #tpu.memory_space<vmem>>, %arg8: memref<128x2xf32, #tpu.memory_space<vmem>>, %arg9: memref<2x1xf32, #tpu.memory_space<vmem>>, %arg10: memref<2x8xf32, #tpu.memory_space<vmem>>) attributes {dimension_semantics = [#tpu.dimension_semantics<parallel>], iteration_bounds = array<i64: 1>, scalar_prefetch = 0 : i64, scratch_operands = 0 : i64, tpu.core_type = #tpu.core_type<tc>, window_params = [{transform_indices = @transform_0, window_bounds = array<i64: 8, 6>}, {pipeline_mode = #tpu.pipeline_mode<synchronous>, transform_indices = @transform_1, window_bounds = array<i64: 6, 128>}, {pipeline_mode = #tpu.pipeline_mode<synchronous>, transform_indices = @transform_2, window_bounds = array<i64: 1, 128>}, {pipeline_mode = #tpu.pipeline_mode<synchronous>, transform_indices = @transform_3, window_bounds = array<i64: 128, 256>}, {pipeline_mode = #tpu.pipeline_mode<synchronous>, transform_indices = @transform_4, window_bounds = array<i64: 1, 256>}, {pipeline_mode = #tpu.pipeline_mode<synchronous>, transform_indices = @transform_5, window_bounds = array<i64: 256, 128>}, {pipeline_mode = #tpu.pipeline_mode<synchronous>, transform_indices = @transform_6, window_bounds = array<i64: 1, 128>}, {pipeline_mode = #tpu.pipeline_mode<synchronous>, transform_indices = @transform_7, window_bounds = array<i64: 128, 2>}, {pipeline_mode = #tpu.pipeline_mode<synchronous>, transform_indices = @transform_8, window_bounds = array<i64: 2, 1>}, {transform_indices = @transform_9, window_bounds = array<i64: 2, 8>}]} {
    %c0 = arith.constant 0 : index
    %c0_0 = arith.constant 0 : index
    %0 = vector.load %arg1[%c0, %c0_0] : memref<8x6xf32, #tpu.memory_space<vmem>>, vector<8x6xf32>
    %c0_1 = arith.constant 0 : index
    %c0_2 = arith.constant 0 : index
    %1 = vector.load %arg2[%c0_1, %c0_2] : memref<6x128xf32, #tpu.memory_space<vmem>>, vector<6x128xf32>
    %cst = arith.constant dense<0.000000e+00> : vector<8x128xf32>
    %2 = tpu.matmul %0, %1, %cst {dimension_numbers = #tpu.dot_dimension_numbers<[1], [0], [0], [1], [0, 0, 1, 1], [], []>} : vector<8x6xf32>, vector<6x128xf32>, vector<8x128xf32> -> vector<8x128xf32>
    %c0_3 = arith.constant 0 : index
    %c0_4 = arith.constant 0 : index
    %3 = vector.load %arg3[%c0_3, %c0_4] : memref<1x128xf32, #tpu.memory_space<vmem>>, vector<1x128xf32>
    %4 = vector.broadcast %3 : vector<1x128xf32> to vector<8x128xf32>
    %5 = arith.addf %2, %4 : vector<8x128xf32>
    %cst_5 = arith.constant 0.000000e+00 : f32
    %6 = vector.broadcast %cst_5 : f32 to vector<8x128xf32>
    %7 = arith.maximumf %5, %6 : vector<8x128xf32>
    %c0_6 = arith.constant 0 : index
    %c0_7 = arith.constant 0 : index
    %8 = vector.load %arg4[%c0_6, %c0_7] : memref<128x256xf32, #tpu.memory_space<vmem>>, vector<128x256xf32>
    %cst_8 = arith.constant dense<0.000000e+00> : vector<8x256xf32>
    %9 = tpu.matmul %7, %8, %cst_8 {dimension_numbers = #tpu.dot_dimension_numbers<[1], [0], [0], [1], [0, 0, 1, 1], [], []>} : vector<8x128xf32>, vector<128x256xf32>, vector<8x256xf32> -> vector<8x256xf32>
    %c0_9 = arith.constant 0 : index
    %c0_10 = arith.constant 0 : index
    %10 = vector.load %arg5[%c0_9, %c0_10] : memref<1x256xf32, #tpu.memory_space<vmem>>, vector<1x256xf32>
    %11 = vector.broadcast %10 : vector<1x256xf32> to vector<8x256xf32>
    %12 = arith.addf %9, %11 : vector<8x256xf32>
    %cst_11 = arith.constant 0.000000e+00 : f32
    %13 = vector.broadcast %cst_11 : f32 to vector<8x256xf32>
    %14 = arith.maximumf %12, %13 : vector<8x256xf32>
    %c0_12 = arith.constant 0 : index
    %c0_13 = arith.constant 0 : index
    %15 = vector.load %arg6[%c0_12, %c0_13] : memref<256x128xf32, #tpu.memory_space<vmem>>, vector<256x128xf32>
    %cst_14 = arith.constant dense<0.000000e+00> : vector<8x128xf32>
    %16 = tpu.matmul %14, %15, %cst_14 {dimension_numbers = #tpu.dot_dimension_numbers<[1], [0], [0], [1], [0, 0, 1, 1], [], []>} : vector<8x256xf32>, vector<256x128xf32>, vector<8x128xf32> -> vector<8x128xf32>
    %c0_15 = arith.constant 0 : index
    %c0_16 = arith.constant 0 : index
    %17 = vector.load %arg7[%c0_15, %c0_16] : memref<1x128xf32, #tpu.memory_space<vmem>>, vector<1x128xf32>
    %18 = vector.broadcast %17 : vector<1x128xf32> to vector<8x128xf32>
    %19 = arith.addf %16, %18 : vector<8x128xf32>
    %cst_17 = arith.constant 0.000000e+00 : f32
    %20 = vector.broadcast %cst_17 : f32 to vector<8x128xf32>
    %21 = arith.maximumf %19, %20 : vector<8x128xf32>
    %c0_18 = arith.constant 0 : index
    %c0_19 = arith.constant 0 : index
    %22 = vector.load %arg8[%c0_18, %c0_19] : memref<128x2xf32, #tpu.memory_space<vmem>>, vector<128x2xf32>
    %cst_20 = arith.constant dense<0.000000e+00> : vector<2x8xf32>
    %23 = tpu.matmul %22, %21, %cst_20 {dimension_numbers = #tpu.dot_dimension_numbers<[0], [1], [1], [0], [0, 1, 1, 0], [], []>} : vector<128x2xf32>, vector<8x128xf32>, vector<2x8xf32> -> vector<2x8xf32>
    %c0_21 = arith.constant 0 : index
    %c0_22 = arith.constant 0 : index
    %24 = vector.load %arg9[%c0_21, %c0_22] : memref<2x1xf32, #tpu.memory_space<vmem>>, vector<2x1xf32>
    %25 = vector.broadcast %24 : vector<2x1xf32> to vector<2x8xf32>
    %26 = arith.addf %23, %25 : vector<2x8xf32>
    %27 = vector.extract_strided_slice %26 {offsets = [0, 0], sizes = [1, 8], strides = [1, 1]} : vector<2x8xf32> to vector<1x8xf32>
    %28 = math.tanh %27 : vector<1x8xf32>
    %c0_23 = arith.constant 0 : index
    %c0_24 = arith.constant 0 : index
    %29 = vector.load %arg10[%c0_23, %c0_24] : memref<2x8xf32, #tpu.memory_space<vmem>>, vector<1x8xf32>
    tpu.vector_store %arg10[%c0_23, %c0_24], %28 {strides = array<i32>} : memref<2x8xf32, #tpu.memory_space<vmem>>, vector<1x8xf32>,
    %30 = vector.extract_strided_slice %26 {offsets = [1, 0], sizes = [1, 8], strides = [1, 1]} : vector<2x8xf32> to vector<1x8xf32>
    %cst_25 = arith.constant 0.000000e+00 : f32
    %31 = vector.broadcast %cst_25 : f32 to vector<1x8xf32>
    %32 = arith.maximumf %30, %31 : vector<1x8xf32>
    %33 = math.absf %30 : vector<1x8xf32>
    %cst_26 = arith.constant 0.000000e+00 : f32
    %34 = vector.broadcast %cst_26 : f32 to vector<1x8xf32>
    %35 = arith.subf %34, %33 : vector<1x8xf32>
    %36 = math.exp %35 : vector<1x8xf32>
    %37 = math.log1p %36 : vector<1x8xf32>
    %38 = arith.addf %32, %37 : vector<1x8xf32>
    %c1 = arith.constant 1 : index
    %c0_27 = arith.constant 0 : index
    %39 = vector.load %arg10[%c1, %c0_27] : memref<2x8xf32, #tpu.memory_space<vmem>>, vector<1x8xf32>
    tpu.vector_store %arg10[%c1, %c0_27], %38 {strides = array<i32>} : memref<2x8xf32, #tpu.memory_space<vmem>>, vector<1x8xf32>,
    return
  }
  func.func @transform_0(%arg0: i32) -> (i32, i32) {
    %c0_i32 = arith.constant 0 : i32
    %c0_i32_0 = arith.constant 0 : i32
    return %arg0, %c0_i32 : i32, i32
  }
  func.func @transform_1(%arg0: i32) -> (i32, i32) {
    %c0_i32 = arith.constant 0 : i32
    %c0_i32_0 = arith.constant 0 : i32
    %c0_i32_1 = arith.constant 0 : i32
    return %c0_i32, %c0_i32_0 : i32, i32
  }
  func.func @transform_2(%arg0: i32) -> (i32, i32) {
    %c0_i32 = arith.constant 0 : i32
    %c0_i32_0 = arith.constant 0 : i32
    %c0_i32_1 = arith.constant 0 : i32
    return %c0_i32, %c0_i32_0 : i32, i32
  }
  func.func @transform_3(%arg0: i32) -> (i32, i32) {
    %c0_i32 = arith.constant 0 : i32
    %c0_i32_0 = arith.constant 0 : i32
    %c0_i32_1 = arith.constant 0 : i32
    return %c0_i32, %c0_i32_0 : i32, i32
  }
  func.func @transform_4(%arg0: i32) -> (i32, i32) {
    %c0_i32 = arith.constant 0 : i32
    %c0_i32_0 = arith.constant 0 : i32
    %c0_i32_1 = arith.constant 0 : i32
    return %c0_i32, %c0_i32_0 : i32, i32
  }
  func.func @transform_5(%arg0: i32) -> (i32, i32) {
    %c0_i32 = arith.constant 0 : i32
    %c0_i32_0 = arith.constant 0 : i32
    %c0_i32_1 = arith.constant 0 : i32
    return %c0_i32, %c0_i32_0 : i32, i32
  }
  func.func @transform_6(%arg0: i32) -> (i32, i32) {
    %c0_i32 = arith.constant 0 : i32
    %c0_i32_0 = arith.constant 0 : i32
    %c0_i32_1 = arith.constant 0 : i32
    return %c0_i32, %c0_i32_0 : i32, i32
  }
  func.func @transform_7(%arg0: i32) -> (i32, i32) {
    %c0_i32 = arith.constant 0 : i32
    %c0_i32_0 = arith.constant 0 : i32
    %c0_i32_1 = arith.constant 0 : i32
    return %c0_i32, %c0_i32_0 : i32, i32
  }
  func.func @transform_8(%arg0: i32) -> (i32, i32) {
    %c0_i32 = arith.constant 0 : i32
    %c0_i32_0 = arith.constant 0 : i32
    %c0_i32_1 = arith.constant 0 : i32
    return %c0_i32, %c0_i32_0 : i32, i32
  }
  func.func @transform_9(%arg0: i32) -> (i32, i32) {
    %c0_i32 = arith.constant 0 : i32
    %c0_i32_0 = arith.constant 0 : i32
    return %c0_i32, %arg0 : i32, i32
  }
}

</mosaic_0001>

<bundles_post_ra>
// kernel: actor_net_forward.1
= control target key start
LH: loop header
LB: loop body
LE: loop exit
PB: predicated region body
PF: predicated region fallthrough
CT: control target
= control target key end

     0   :  { %14 = vsyncpa [#allocation3], 0  ;;  %s869_s0 = inlined_call_operand.vmem [shape: f32[8,6], index: 0, kind: input, shape index: {}]   ;;  %s870_s1 = inlined_call_operand.vmem [shape: f32[6,128], index: 1, kind: input, shape index: {}]   ;;  %s871_s2 = inlined_call_operand.vmem [shape: f32[1,128], index: 2, kind: input, shape index: {}]   ;;  %s872_s3 = inlined_call_operand.hbm [shape: f32[128,256], index: 3, kind: input, shape index: {}]   ;;  %s873_s4 = inlined_call_operand.vmem [shape: f32[1,256], index: 4, kind: input, shape index: {}]   ;;  %s874_s5 = inlined_call_operand.hbm [shape: f32[256,128], index: 5, kind: input, shape index: {}]   ;;  %s875_s6 = inlined_call_operand.vmem [shape: f32[1,128], index: 6, kind: input, shape index: {}]   ;;  %s876_s7 = inlined_call_operand.vmem [shape: f32[128,2], index: 7, kind: input, shape index: {}]   ;;  %s877_s8 = inlined_call_operand.vmem [shape: f32[2,1], index: 8, kind: input, shape index: {}]   ;;  %s878_s9 = inlined_call_operand.vmem [shape: f32[2,8], index: 9, kind: output, shape index: {}]  }
   0x1   :  { %15 = vsyncpa [#allocation5], 0  ;;  %s707_s30 = smov [#allocation2]   ;;  %s659_s13 = scalar_lea.hbm %s872_s3, 4096 }
   0x2   :  { %s27_s10 = sshll.u32 %s707_s30, 4  ;;  %p660_p0 = scmp.ne.s32.totalorder %s872_s3, %s659_s13  ;;  %s28_s10 = int_to_ptr.vmem [resolvable:$true] %s27_s10 }
   0x3   :  { %p663_p1 = scmp.lt.u32.totalorder %s659_s13, %s872_s3 }
   0x5   :  { %p665_p2 = pnand %p663_p1, %p660_p0 }
   0x7   :  { %668 = shalt.err (!%p665_p2)
}
   0x8   :  { %s669_s18 = scalar_lea.vmem %s28_s10, 4096  ;;  %p674_p4 = scmp.lt.s32.totalorder %s28_s10, %s28_s10 }
   0x9   :  { %p670_p3 = scmp.ne.s32.totalorder %s28_s10, %s669_s18  ;;  %p675_p5 = scmp.lt.s32.totalorder %s669_s18, %s669_s18 }
   0xb   :  { %p676_p6 = por %p675_p5, %p674_p4 }
   0xd   :  { %p677_p7 = pnand %p676_p6, %p670_p3 }
   0xf   :  { %680 = shalt.err (!%p677_p7)
}
  0x10   :  { %s708_s19 = smov 256   ;;  %s709_s20 = smov 16  }
  0x11   :  { %33 = dma.hbm_to_vmem [thread:$0]  %s872_s3, 4096, %s28_s10, [#allocation3], %s708_s19, %s708_s19, %s709_s20  }
  0x12   :  { %s710_s23 = smov [#allocation4]   ;;  %s681_s27 = scalar_lea.hbm %s874_s5, 4096 }
  0x13   :  { %s41_s24 = sshll.u32 %s710_s23, 4  ;;  %p682_p8 = scmp.ne.s32.totalorder %s874_s5, %s681_s27  ;;  %s42_s24 = int_to_ptr.vmem [resolvable:$true] %s41_s24 }
  0x14   :  { %p685_p9 = scmp.lt.u32.totalorder %s681_s27, %s874_s5 }
  0x16   :  { %p687_p10 = pnand %p685_p9, %p682_p8 }
  0x18   :  { %690 = shalt.err (!%p687_p10)
}
  0x19   :  { %s691_s12 = scalar_lea.vmem %s42_s24, 4096  ;;  %p696_p12 = scmp.lt.s32.totalorder %s42_s24, %s42_s24 }
  0x1a   :  { %p692_p11 = scmp.ne.s32.totalorder %s42_s24, %s691_s12  ;;  %p697_p13 = scmp.lt.s32.totalorder %s691_s12, %s691_s12 }
  0x1c   :  { %p698_p0 = por %p697_p13, %p696_p12 }
  0x1e   :  { %p699_p1 = pnand %p698_p0, %p692_p11 }
  0x20   :  { %702 = shalt.err (!%p699_p1)
}
  0x21   :  { %s711_s3 = smov 128   ;;  %s712_s10 = smov 8  }
  0x22   :  { %47 = dma.hbm_to_vmem [thread:$0]  %s874_s5, 4096, %s42_s24, [#allocation5], %s711_s3, %s711_s3, %s712_s10  }
  0x23   :  { %703 = dma.done.wait [#allocation3], 4096  }
  0x24   :  { %704 = vsyncadd [#allocation3], 4294963200 }
  0x25   :  { %705 = dma.done.wait [#allocation5], 4096  }
  0x26   :  { %706 = vsyncadd [#allocation5], 4294963200  ;;  %v713_v0 = vmov 0.0   ;;  %vm714_vm0 = vmmov 0   ;;  %vm73_vm1 = vcmask 1045504   ;;  %vm69_vm2 = vcmask 48128  }
  0x27   :  { %568 = vmatprep.subr.mxu0 %v713_v0  ;;  %570 = vmatprep.mubr.msk.f32.mxu0 %vm714_vm0, %v713_v0  ;;  %v61_v1 = vld [vmem:[%s870_s1] sm:$0x3f]  ;;  %v149_v3 = vld [vmem:[#allocation2 + $0x8] sm:$0xff]  ;;  %v151_v4 = vld [vmem:[#allocation2 + $0x18] sm:$0xff]  ;;  %vm500_vm3 = vcmask 57344   ;;  %vm517_vm5 = vcmask 58369  }
  0x28   :  { %256 = vmatprep.mubr.f32.mxu1 %v713_v0  ;;  %v60_v2 = vld [vmem:[%s869_s0] sm:$0xff]  ;;  %569 = vmatpush3.msk.msra.mxu0 %vm73_vm1, %v61_v1  ;;  %v150_v6 = vld [vmem:[#allocation2 + $0x10] sm:$0xff]  ;;  %v578_v7 = vpack.c.bf16 %v151_v4, %v149_v3  ;;  %v153_v9 = vld [vmem:[#allocation2 + $0x28] sm:$0xff] }
  0x29   :  { %v148_v5 = vld [vmem:[#allocation2] sm:$0xff]  ;;  %571 = vmatmul.mubr.msk.f32.vlgmr.msra.gmra.mrb[0].mxu0 %vm69_vm2, %v60_v2  ;;  %v155_v10 = vld [vmem:[#allocation2 + $0x38] sm:$0xff]  ;;  %v154_v13 = vld [vmem:[#allocation2 + $0x30] sm:$0xff] }
  0x2a   :  { %v580_v8 = vpack.c.bf16 %v150_v6, %v148_v5  ;;  %v152_v11 = vld [vmem:[#allocation2 + $0x20] sm:$0xff]  ;;  %v582_v12 = vpack.c.bf16 %v155_v10, %v153_v9  ;;  %v157_v14 = vld [vmem:[#allocation2 + $0x48] sm:$0xff]  ;;  %v159_v15 = vld [vmem:[#allocation2 + $0x58] sm:$0xff]  ;;  %579 = vmatprep.subr.bf16.mxu1 %v578_v7 }
  0x2b   :  { %v584_v16 = vpack.c.bf16 %v154_v13, %v152_v11  ;;  %v586_v17 = vpack.c.bf16 %v159_v15, %v157_v14  ;;  %v156_v18 = vld [vmem:[#allocation2 + $0x40] sm:$0xff]  ;;  %v158_v19 = vld [vmem:[#allocation2 + $0x50] sm:$0xff]  ;;  %v161_v20 = vld [vmem:[#allocation2 + $0x68] sm:$0xff] }
  0x2c   :  { %581 = vmatpush1.bf16.msra.mxu1 %v580_v8  ;;  %v163_v21 = vld [vmem:[#allocation2 + $0x78] sm:$0xff]  ;;  %v588_v22 = vpack.c.bf16 %v158_v19, %v156_v18  ;;  %v160_v24 = vld [vmem:[#allocation2 + $0x60] sm:$0xff]  ;;  %v162_v25 = vld [vmem:[#allocation2 + $0x70] sm:$0xff] }
  0x2d   :  { %583 = vmatprep.subr.bf16.mxu1 %v582_v12  ;;  %v590_v23 = vpack.c.bf16 %v163_v21, %v161_v20  ;;  %v165_v26 = vld [vmem:[#allocation2 + $0x88] sm:$0xff]  ;;  %v167_v27 = vld [vmem:[#allocation2 + $0x98] sm:$0xff]  ;;  %v592_v28 = vpack.c.bf16 %v162_v25, %v160_v24  ;;  %v164_v30 = vld [vmem:[#allocation2 + $0x80] sm:$0xff] }
  0x2e   :  { %v594_v29 = vpack.c.bf16 %v167_v27, %v165_v26  ;;  %v166_v31 = vld [vmem:[#allocation2 + $0x90] sm:$0xff]  ;;  %v169_v32 = vld [vmem:[#allocation2 + $0xa8] sm:$0xff]  ;;  %v171_v33 = vld [vmem:[#allocation2 + $0xb8] sm:$0xff] }
  0x2f   :  { %v596_v34 = vpack.c.bf16 %v166_v31, %v164_v30  ;;  %v598_v35 = vpack.c.bf16 %v171_v33, %v169_v32  ;;  %v168_v36 = vld [vmem:[#allocation2 + $0xa0] sm:$0xff]  ;;  %v170_v37 = vld [vmem:[#allocation2 + $0xb0] sm:$0xff]  ;;  %v173_v38 = vld [vmem:[#allocation2 + $0xc8] sm:$0xff] }
  0x30   :  { %585 = vmatpush1.bf16.msra.mxu1 %v584_v16  ;;  %v175_v39 = vld [vmem:[#allocation2 + $0xd8] sm:$0xff]  ;;  %v600_v40 = vpack.c.bf16 %v170_v37, %v168_v36  ;;  %v172_v42 = vld [vmem:[#allocation2 + $0xc0] sm:$0xff]  ;;  %v174_v43 = vld [vmem:[#allocation2 + $0xd0] sm:$0xff] }
  0x31   :  { %587 = vmatprep.subr.bf16.mxu1 %v586_v17  ;;  %v602_v41 = vpack.c.bf16 %v175_v39, %v173_v38  ;;  %v604_v44 = vpack.c.bf16 %v174_v43, %v172_v42  ;;  %v177_v45 = vld [vmem:[#allocation2 + $0xe8] sm:$0xff]  ;;  %v179_v46 = vld [vmem:[#allocation2 + $0xf8] sm:$0xff]  ;;  %v176_v48 = vld [vmem:[#allocation2 + $0xe0] sm:$0xff] }
  0x32   :  { %v606_v47 = vpack.c.bf16 %v179_v46, %v177_v45  ;;  %v178_v49 = vld [vmem:[#allocation2 + $0xf0] sm:$0xff]  ;;  %v281_v51 = vld [vmem:[#allocation4 + $0x80] sm:$0xff]  ;;  %v282_v52 = vld [vmem:[#allocation4 + $0x88] sm:$0xff] }
  0x33   :  { %v608_v50 = vpack.c.bf16 %v178_v49, %v176_v48  ;;  %v265_v53 = vld [vmem:[#allocation4] sm:$0xff]  ;;  %v610_v54 = vpack.c.bf16 %v282_v52, %v281_v51  ;;  %v266_v55 = vld [vmem:[#allocation4 + $0x8] sm:$0xff]  ;;  %v283_v56 = vld [vmem:[#allocation4 + $0x90] sm:$0xff] }
  0x34   :  { %589 = vmatpush1.bf16.msra.mxu1 %v588_v22  ;;  %v284_v57 = vld [vmem:[#allocation4 + $0x98] sm:$0xff]  ;;  %v612_v58 = vpack.c.bf16 %v266_v55, %v265_v53  ;;  %v267_v60 = vld [vmem:[#allocation4 + $0x10] sm:$0xff]  ;;  %v285_v62 = vld [vmem:[#allocation4 + $0xa0] sm:$0xff] }
  0x35   :  { %591 = vmatprep.subr.bf16.mxu1 %v590_v23  ;;  %v614_v59 = vpack.c.bf16 %v284_v57, %v283_v56  ;;  %v268_v61 = vld [vmem:[#allocation4 + $0x18] sm:$0xff]  ;;  %611 = vmatprep.subr.bf16.mxu0 %v610_v54  ;;  %v286_v63 = vld [vmem:[#allocation4 + $0xa8] sm:$0xff]  ;;  %v269_v3 = vld [vmem:[#allocation4 + $0x20] sm:$0xff]  ;;  %v182_v56 = vlaneseq }
  0x36   :  { %613 = vmatpush3.bf16.msra.mxu0 %v612_v58  ;;  %v616_v1 = vpack.c.bf16 %v268_v61, %v267_v60  ;;  %v618_v2 = vpack.c.bf16 %v286_v63, %v285_v62  ;;  %v270_v4 = vld [vmem:[#allocation4 + $0x28] sm:$0xff]  ;;  %v287_v5 = vld [vmem:[#allocation4 + $0xb0] sm:$0xff]  ;;  %v288_v6 = vld [vmem:[#allocation4 + $0xb8] sm:$0xff] }
  0x37   :  { %615 = vmatprep.subr.bf16.mxu0 %v614_v59  ;;  %v620_v7 = vpack.c.bf16 %v270_v4, %v269_v3  ;;  %v622_v8 = vpack.c.bf16 %v288_v6, %v287_v5  ;;  %v271_v9 = vld [vmem:[#allocation4 + $0x30] sm:$0xff]  ;;  %v272_v10 = vld [vmem:[#allocation4 + $0x38] sm:$0xff]  ;;  %v289_v11 = vld [vmem:[#allocation4 + $0xc0] sm:$0xff]  ;;  %v183_v57 = vshrl.u32 %v182_v56, 7 }
  0x38   :  { %593 = vmatpush1.bf16.msra.mxu1 %v592_v28  ;;  %v290_v12 = vld [vmem:[#allocation4 + $0xc8] sm:$0xff]  ;;  %v624_v13 = vpack.c.bf16 %v272_v10, %v271_v9  ;;  %v273_v15 = vld [vmem:[#allocation4 + $0x40] sm:$0xff]  ;;  %v291_v17 = vld [vmem:[#allocation4 + $0xd0] sm:$0xff] }
  0x39   :  { %595 = vmatprep.subr.bf16.mxu1 %v594_v29  ;;  %v626_v14 = vpack.c.bf16 %v290_v12, %v289_v11  ;;  %v274_v16 = vld [vmem:[#allocation4 + $0x48] sm:$0xff]  ;;  %v292_v18 = vld [vmem:[#allocation4 + $0xd8] sm:$0xff]  ;;  %v275_v21 = vld [vmem:[#allocation4 + $0x50] sm:$0xff]  ;;  %v184_v58 = vsub.s32 0, %v183_v57  ;;  %v188_v60 = vsub.s32 1, %v183_v57 }
  0x3a   :  { %617 = vmatpush3.bf16.msra.mxu0 %v616_v1  ;;  %v628_v19 = vpack.c.bf16 %v274_v16, %v273_v15  ;;  %v630_v20 = vpack.c.bf16 %v292_v18, %v291_v17  ;;  %v276_v22 = vld [vmem:[#allocation4 + $0x58] sm:$0xff]  ;;  %v293_v23 = vld [vmem:[#allocation4 + $0xe0] sm:$0xff]  ;;  %v294_v24 = vld [vmem:[#allocation4 + $0xe8] sm:$0xff] }
  0x3b   :  { %619 = vmatprep.subr.bf16.mxu0 %v618_v2  ;;  %v632_v25 = vpack.c.bf16 %v276_v22, %v275_v21  ;;  %v634_v26 = vpack.c.bf16 %v294_v24, %v293_v23  ;;  %v525_v27 = vld [vmem:[%s871_s2] ss:$0 sm:$0xff]  ;;  %v278_v33 = vld [vmem:[#allocation4 + $0x68] sm:$0xff]  ;;  %v296_v36 = vld [vmem:[#allocation4 + $0xf8] sm:$0xff] }
  0x3c   :  { %597 = vmatpush1.bf16.msra.mxu1 %v596_v34  ;;  %v277_v32 = vld [vmem:[#allocation4 + $0x60] sm:$0xff]  ;;  %v279_v38 = vld [vmem:[#allocation4 + $0x70] sm:$0xff]  ;;  %v280_v39 = vld [vmem:[#allocation4 + $0x78] sm:$0xff] }
  0x3d   :  { %599 = vmatprep.subr.bf16.mxu1 %v598_v35  ;;  %v636_v34 = vpack.c.bf16 %v278_v33, %v277_v32  ;;  %v295_v35 = vld [vmem:[#allocation4 + $0xf0] sm:$0xff]  ;;  %v378_v43 = vld [vmem:[%s876_s7 + $0x18] sm:$0xff]  ;;  %v380_v45 = vld [vmem:[%s876_s7 + $0x28] sm:$0xff] }
  0x3e   :  { %621 = vmatpush3.bf16.msra.mxu0 %v620_v7  ;;  %v638_v37 = vpack.c.bf16 %v296_v36, %v295_v35  ;;  %v377_v42 = vld [vmem:[%s876_s7 + $0x10] sm:$0xff]  ;;  %v383_v48 = vld [vmem:[%s876_s7 + $0x40] sm:$0xff]  ;;  %v384_v49 = vld [vmem:[%s876_s7 + $0x48] sm:$0xff]  ;;  %v715_v7 = vmov 0  }
  0x3f   :  { %623 = vmatprep.subr.bf16.mxu0 %v622_v8  ;;  %v381_v46 = vld [vmem:[%s876_s7 + $0x30] sm:$0xff]  ;;  %v386_v51 = vld [vmem:[%s876_s7 + $0x58] sm:$0xff]  ;;  %v387_v52 = vld [vmem:[%s876_s7 + $0x60] sm:$0xff]  ;;  %651 = vset.pattern.permute.xlu1 %v715_v7 }
  0x40   :  { %601 = vmatpush1.bf16.msra.mxu1 %v600_v40  ;;  %v640_v40 = vpack.c.bf16 %v280_v39, %v279_v38  ;;  %v388_v53 = vld [vmem:[%s876_s7 + $0x68] sm:$0xff]  ;;  %v389_v54 = vld [vmem:[%s876_s7 + $0x70] sm:$0xff]  ;;  %v390_v55 = vld [vmem:[%s876_s7 + $0x78] sm:$0xff] }
  0x41   :  { %603 = vmatprep.subr.bf16.mxu1 %v602_v41  ;;  %v375_v41 = vld [vmem:[%s876_s7] sm:$0xff] }
  0x42   :  { %625 = vmatpush3.bf16.msra.mxu0 %v624_v13  ;;  %397 = vxpose.xlu0.b32.start [1/16] (narrow) %v375_v41, 8  ;;  %v180_v59 = vld [vmem:[%s873_s4] sm:$0x3] }
  0x43   :  { %627 = vmatprep.subr.bf16.mxu0 %v626_v14  ;;  %v185_v61 = vrot.slane %v180_v59, %v184_v58  ;;  %v189_v62 = vrot.slane %v180_v59, %v188_v60  ;;  %v391_v6 = vld [vmem:[%s877_s8] sm:$0x3] }
  0x44   :  { %605 = vmatpush1.bf16.msra.mxu1 %v604_v44  ;;  %v379_v44 = vld [vmem:[%s876_s7 + $0x20] sm:$0xff]  ;;  %394 = vperm.xlu1 %651, %v391_v6  }
  0x45   :  { %607 = vmatprep.subr.bf16.mxu1 %v606_v47  ;;  %v382_v47 = vld [vmem:[%s876_s7 + $0x38] sm:$0xff]  ;;  %v528_v9 = vld [vmem:[%s875_s6] ss:$0 sm:$0xff] }
  0x46   :  { %629 = vmatpush3.bf16.msra.mxu0 %v628_v19 }
  0x47   :  { %631 = vmatprep.subr.bf16.mxu0 %v630_v20 }
  0x48   :  { %609 = vmatpush1.bf16.msra.mxu1 %v608_v50  ;;  %v385_v50 = vld [vmem:[%s876_s7 + $0x50] sm:$0xff] }
  0x49   :  { %573 = vmatprep.subr.mxu1 %v713_v0 }
  0x4a   :  { %633 = vmatpush3.bf16.msra.mxu0 %v632_v25 }
  0x4b   :  { %635 = vmatprep.subr.bf16.mxu0 %v634_v26 }
  0x4e   :  { %637 = vmatpush3.bf16.msra.mxu0 %v636_v34 }
  0x4f   :  { %639 = vmatprep.subr.bf16.mxu0 %v638_v37 }
  0x52   :  { %641 = vmatpush3.bf16.msra.mxu0 %v640_v40 }
  0xc3   :  { %v395_v15 = vpop.permute.xlu1 %394 }
  0xfc   :  { %v143_v28 = vpop.f32.mrb[0].mxu0 }
  0xfd   :  { %v144_v29 = vadd.f32 %v525_v27, %v143_v28  ;;  %v572_v30 = vpop.f32.mrb[1].mxu0 }
  0xff   :  { %v147_v31 = vmax.f32 %v144_v29, 0.0 }
 0x101   :  { %257 = vmatmul.mubr.f32.vlgmr.msra.gmra.mrb[0].mxu1 %v147_v31 }
 0x102   :  { %575 = vmatprep.mubr.msk.f32.mxu1 %vm714_vm0, %v713_v0  ;;  %v376_v0 = vld [vmem:[%s876_s7 + $0x8] sm:$0xff] }
 0x103   :  { %398 = vxpose.xlu0.b32.cont [2/16] (narrow) %v376_v0, 8 }
 0x107   :  { %399 = vxpose.xlu0.b32.cont [3/16] (narrow) %v377_v42, 8 }
 0x10b   :  { %400 = vxpose.xlu0.b32.cont [4/16] (narrow) %v378_v43, 8 }
 0x10f   :  { %401 = vxpose.xlu0.b32.cont [5/16] (narrow) %v379_v44, 8 }
 0x113   :  { %402 = vxpose.xlu0.b32.cont [6/16] (narrow) %v380_v45, 8 }
 0x117   :  { %403 = vxpose.xlu0.b32.cont [7/16] (narrow) %v381_v46, 8 }
 0x11b   :  { %404 = vxpose.xlu0.b32.cont [8/16] (narrow) %v382_v47, 8 }
 0x11f   :  { %405 = vxpose.xlu0.b32.cont [9/16] (narrow) %v383_v48, 8 }
 0x123   :  { %406 = vxpose.xlu0.b32.cont [10/16] (narrow) %v384_v49, 8 }
 0x127   :  { %407 = vxpose.xlu0.b32.cont [11/16] (narrow) %v385_v50, 8 }
 0x12b   :  { %408 = vxpose.xlu0.b32.cont [12/16] (narrow) %v386_v51, 8 }
 0x12f   :  { %409 = vxpose.xlu0.b32.cont [13/16] (narrow) %v387_v52, 8 }
 0x133   :  { %410 = vxpose.xlu0.b32.cont [14/16] (narrow) %v388_v53, 8 }
 0x137   :  { %411 = vxpose.xlu0.b32.cont [15/16] (narrow) %v389_v54, 8 }
 0x13b   :  { %412 = vxpose.xlu0.b32.end [16/16] (narrow) %v390_v55, 8 }
 0x164   :  { %652 = vset.pattern.permute.xlu0 %v715_v7 }
 0x17f   :  { %v413_v14 = vpop.trf.xlu0 }
 0x1d4   :  { %v258_v63 = vpop.f32.mrb[0].mxu1 }
 0x1d5   :  { %v259_v1 = vadd.f32 %v258_v63, %v185_v61  ;;  %v260_v2 = vpop.f32.mrb[1].mxu1 }
 0x1d6   :  { %v261_v3 = vadd.f32 %v260_v2, %v189_v62 }
 0x1d7   :  { %v263_v5 = vmax.f32 %v259_v1, 0.0 }
 0x1d8   :  { %v264_v4 = vmax.f32 %v261_v3, 0.0 }
 0x1da   :  { %368 = vmatprep.mubr.f32.mxu0 %v264_v4 }
 0x1db   :  { %369 = vmatmul.mubr.f32.vlgmr.msra.gmra.mrb[2].mxu0 %v263_v5 }
 0x2ae   :  { %v563_v8 = vpop.f32.mrb[2].mxu0 }
 0x2af   :  { %v564_v10 = vpop.f32.mrb[3].mxu0 }
 0x2b0   :  { %v565_v11 = vadd.f32 %v564_v10, %v563_v8 }
 0x2b2   :  { %v371_v12 = vadd.f32 %v565_v11, %v528_v9 }
 0x2b4   :  { %v374_v13 = vmax.f32 %v371_v12, 0.0 }
 0x2b6   :  { %574 = vmatpush3.xpose.msra.mxu1 %v374_v13 }
 0x2b9   :  { %576 = vmatmul.mubr.f32.vlgmr.msra.gmra.mrb[2].mxu1 %v413_v14 }
 0x38c   :  { %v495_v16 = vpop.f32.mrb[2].mxu1 }
 0x38d   :  { %v496_v17 = vadd.f32 %v495_v16, %v395_v15  ;;  %v577_v18 = vpop.f32.mrb[3].mxu1 }
 0x38f   :  { %653 = vtanh.f32 %v496_v17  ;;  %v503_v19 = vand.u32 2147483647, %v496_v17  ;;  %v502_v31 = vmax.f32 %v496_v17, 0.0 }
 0x391   :  { %v504_v20 = vsub.f32 0.0, %v503_v19 }
 0x393   :  { %v505_v21 = vmul.f32 1.442695, %v504_v20 }
 0x395   :  { %655 = vpow2.f32 %v505_v21 }
 0x399   :  { %v654_v22 = vpop.eup %653 }
 0x39a   :  { %501 = vst.msk [vmem:[%s878_s9] sm:$0x1] %vm500_vm3, %v654_v22 }
 0x39f   :  { %v656_v23 = vpop.eup %655 }
 0x3a0   :  { %v507_v24 = vadd.f32 1.0, %v656_v23  ;;  %v510_v25 = vmul.f32 -0.5, %v656_v23  ;;  %v513_v27 = vand.u32 2147483647, %v656_v23 }
 0x3a2   :  { %657 = vlog2.f32 %v507_v24  ;;  %v511_v26 = vadd.f32 1.0, %v510_v25  ;;  %vm514_vm4 = vcmp.lt.f32.partialorder %v513_v27, 0.0004427343 }
 0x3a4   :  { %v512_v30 = vmul.f32 %v656_v23, %v511_v26 }
 0x3ac   :  { %v658_v28 = vpop.eup %657 }
 0x3ad   :  { %v509_v29 = vmul.f32 0.6931472, %v658_v28 }
 0x3af   :  { %v515_v32 = vsel %vm514_vm4, %v512_v30, %v509_v29 }
 0x3b0   :  { %v516_v33 = vadd.f32 %v515_v32, %v502_v31 }
 0x3b2   :  { %518 = vst.msk [vmem:[%s878_s9] sm:$0x2] %vm517_vm5, %v516_v33 }
 0x3b3   :  { %523 = vsyncpa [#allocation3], 1 }
 0x3b4   :  { %524 = vsyncpa [#allocation5], 1 }

</bundles_post_ra>
